<compile_context>
chip_gen: v5e
topology: v5e:2x2
jax: 0.10.0
libtpu: 0.0.40
codegen_flags: <defaults>
</compile_context>

<pallas_src>
import functools

import jax
import jax.numpy as jnp
from jax import lax
from jax.experimental import pallas as pl
from jax.experimental.pallas import tpu as pltpu


def _round_up(v, m):
    return ((v + m - 1) // m) * m


def _vmem_capacity_bytes() -> int:
    """Physical VMEM per TensorCore; conservative fallback if query fails."""
    try:
        return int(pltpu.get_tpu_info().vmem_capacity_bytes)
    except Exception:
        return 64 * 1024 * 1024  # v7x per-TC VMEM (smallest of v5e/v6e/v7x)


def _choose_tiling(n, c, it_logits, it_labels, vmem_cap):
    """Pick (block_rows, chunk_rows, sublane_mult).

    block_rows : rows per DMA tile (BlockSpec).
    chunk_rows : rows per in-kernel compute chunk (bounds live f32 temporaries).
    """
    # Sublane packing multiple for the narrowest dtype (8 f32 / 16 bf16 / 32 i8).
    mult = max(8, 32 // max(min(it_logits, it_labels), 1))
    n_pad = _round_up(n, mult)

    # --- compute chunk: keep ~6 live f32 (chunk, C) temporaries under ~4 MiB.
    temps_budget = 4 * 1024 * 1024
    per_row_temps = 6 * 4 * c
    chunk = temps_budget // per_row_temps
    if chunk >= 128:
        # Multiple of 128 so per-chunk lane-offset output stores stay aligned.
        chunk = min(1024, (chunk // 128) * 128)
        single_chunk_only = False
    else:
        # Huge-C regime: one chunk per (small) tile.
        chunk = max(mult, (chunk // mult) * mult)
        single_chunk_only = True
    if chunk >= n_pad:
        chunk = n_pad
        single_chunk_only = True

    per_row_in = c * (it_logits + it_labels)
    is_small_vmem = vmem_cap <= 80 * 1024 * 1024          # v7x-like: 64 MiB, 2 TCs
    target_bytes = (20 << 20) if is_small_vmem else (28 << 20)
    usable = (vmem_cap * 3) // 4
    temps_bytes = per_row_temps * chunk

    if single_chunk_only:
        rows = chunk
    else:
        rows = max(chunk, target_bytes // per_row_in)
        # 2 inputs x 2 pipeline buffers + temporaries must fit ~3/4 of VMEM.
        rows_cap = max(chunk, (usable - temps_bytes - (1 << 20)) // (2 * per_row_in))
        rows = min(rows, rows_cap)
        # Keep >= 2 grid steps per TensorCore when N allows (v7x has 2 TCs).
        min_tiles = 4 if is_small_vmem else 2
        rows = min(rows, max(chunk, _round_up(pl.cdiv(n, min_tiles), chunk)))
        rows = max(chunk, (rows // chunk) * chunk)
        rows = min(rows, _round_up(n_pad, chunk))
    return rows, chunk, mult


def _chunk_row_loss(logits_ref, labels_ref, r0, chunk_rows):
    """Per-row soft-label CE for rows [r0, r0+chunk_rows) of the current tile."""
    x = logits_ref[pl.ds(r0, chunk_rows), :].astype(jnp.float32)      # (R, C)
    y = labels_ref[pl.ds(r0, chunk_rows), :].astype(jnp.float32)      # (R, C)
    m = jnp.max(x, axis=-1, keepdims=True)                            # (R, 1)
    lse = jnp.log(jnp.sum(jnp.exp(x - m), axis=-1, keepdims=True))    # (R, 1)
    # loss_i = -sum_c log_softmax(x)_ic * y_ic = sum_c y_ic * (lse + m - x)_ic
    # (3 cross-lane reductions per row instead of 4; no materialized log_softmax.)
    return jnp.sum(y * ((lse + m) - x), axis=-1, keepdims=True)       # (R, 1)


def _mask_padded_rows(loss, tile_idx, block_rows, r0, chunk_rows, n_rows):
    # Edge-tile padding rows read uninitialized VMEM; exp() of garbage may be
    # Inf/NaN.  jnp.where *selects*, so scrubbing the per-row loss to 0 here is
    # safe as long as every reduction up to this point is strictly row-local.
    row_ids = tile_idx * block_rows + r0 + lax.broadcasted_iota(
        jnp.int32, (chunk_rows, 1), 0)
    return jnp.where(row_ids < n_rows, loss, 0.0)


def _per_row_loss_kernel(logits_ref, labels_ref, out_ref, *,
                         n_rows, block_rows, chunk_rows, ragged):
    """reduction='none': lane-dense per-row losses, chunked over the tile."""
    i = pl.program_id(0)
    num_chunks = block_rows // chunk_rows

    def emit(r0):
        loss = _chunk_row_loss(logits_ref, labels_ref, r0, chunk_rows)
        if ragged:
            loss = _mask_padded_rows(loss, i, block_rows, r0, chunk_rows, n_rows)
        # Lane-dense store: (R, 1) -> (1, R).
        out_ref[:, pl.ds(r0, chunk_rows)] = loss.reshape(1, chunk_rows)

    if num_chunks == 1:
        emit(0)
    else:
        def body(ci, carry):
            emit(pl.multiple_of(ci * chunk_rows, chunk_rows))
            return carry
        lax.fori_loop(0, num_chunks, body, 0)


def _tile_sum_kernel(logits_ref, labels_ref, out_ref, *,
                     n_rows, block_rows, chunk_rows, ragged):
    """reduction='mean'/'sum': one partial loss sum per tile (lane 0 of (1,128))."""
    i = pl.program_id(0)
    num_chunks = block_rows // chunk_rows

    def partial_sum(r0):
        loss = _chunk_row_loss(logits_ref, labels_ref, r0, chunk_rows)
        if ragged:
            loss = _mask_padded_rows(loss, i, block_rows, r0, chunk_rows, n_rows)
        return jnp.sum(loss, keepdims=True)                           # (1, 1)

    if num_chunks == 1:
        total = partial_sum(0)
    else:
        def body(ci, acc):
            return acc + partial_sum(pl.multiple_of(ci * chunk_rows, chunk_rows))
        total = lax.fori_loop(0, num_chunks, body, jnp.zeros((1, 1), jnp.float32))

    lane = lax.broadcasted_iota(jnp.int32, (1, 128), 1)
    out_ref[...] = jnp.where(lane == 0, total, 0.0)


def scattered_cross_entropy_loss(logits, labels, reduction="mean",
                                 block_rows=None, chunk_rows=None):
    """Pallas implementation of ScatteredCrossEntropyLoss.forward.

    logits, labels: (N, C) float arrays (any float dtype; upcast in-kernel).
    reduction: "none" | "mean" | "sum".
    block_rows / chunk_rows: optional overrides (rounded to sublane multiples;
    invalid chunk overrides fall back to a single chunk per tile).
    """
    N, C = logits.shape
    assert labels.shape == (N, C), (
        f"label tensor shape is {labels.shape}, "
        f"while logits tensor shape is {logits.shape}")
    if reduction not in ("none", "mean", "sum"):
        raise AssertionError("reduction has to be none, mean or sum")

    it_logits = logits.dtype.itemsize
    it_labels = labels.dtype.itemsize
    vmem_cap = _vmem_capacity_bytes()

    rows, chunk, mult = _choose_tiling(N, C, it_logits, it_labels, vmem_cap)
    if block_rows is not None:
        rows = max(mult, _round_up(int(block_rows), mult))
        if chunk_rows is None:
            chunk = rows
        else:
            chunk = max(mult, _round_up(int(chunk_rows), mult))
            # Keep chunk | rows and lane-offset stores 128-aligned.
            if rows % chunk != 0 or (rows > chunk and chunk % 128 != 0):
                chunk = rows

    num_tiles = pl.cdiv(N, rows)
    ragged = (N % rows) != 0

    # VMEM budget: double-buffered inputs + double-buffered output tile
    # + live f32 compute temporaries (~6 arrays of (chunk, C)) + headroom.
    tile_in_bytes = rows * C * (it_logits + it_labels)
    temps_bytes = 6 * 4 * chunk * C
    out_tile_bytes = max(rows, 128) * 4
    needed = 2 * tile_in_bytes + 2 * out_tile_bytes + temps_bytes + (2 << 20)
    vmem_limit = int(min(vmem_cap * 7 // 8, max(needed + (2 << 20), 32 << 20)))

    cost = pl.CostEstimate(
        flops=int(5 * N * C),
        transcendentals=int(N * C + N),
        bytes_accessed=int(N * C * (it_logits + it_labels) + num_tiles * rows * 4),
    )
    cparams = pltpu.CompilerParams(
        dimension_semantics=("parallel",),
        vmem_limit_bytes=vmem_limit,
    )
    in_specs = [
        pl.BlockSpec((rows, C), lambda i: (i, 0)),
        pl.BlockSpec((rows, C), lambda i: (i, 0)),
    ]

    if reduction == "none":
        losses = pl.pallas_call(
            functools.partial(_per_row_loss_kernel, n_rows=N, block_rows=rows,
                              chunk_rows=chunk, ragged=ragged),
            out_shape=jax.ShapeDtypeStruct((num_tiles, rows), jnp.float32),
            grid=(num_tiles,),
            in_specs=in_specs,
            out_specs=pl.BlockSpec((1, rows), lambda i: (i, 0)),
            compiler_params=cparams,
            cost_estimate=cost,
        )(logits, labels)
        return losses.reshape(-1)[:N]

    partials = pl.pallas_call(
        functools.partial(_tile_sum_kernel, n_rows=N, block_rows=rows,
                          chunk_rows=chunk, ragged=ragged),
        out_shape=jax.ShapeDtypeStruct((num_tiles, 128), jnp.float32),
        grid=(num_tiles,),
        in_specs=in_specs,
        out_specs=pl.BlockSpec((1, 128), lambda i: (i, 0)),
        compiler_params=cparams,
        cost_estimate=cost,
    )(logits, labels)
    # Padded rows were masked to 0 in-kernel, so this sum is exact.
    total = jnp.sum(partials)
    if reduction == "mean":
        return total / N
    return total


class ScatteredCrossEntropyLoss:
    """Mirror of the PyTorch module (forward only)."""

    def __init__(self, reduction="mean"):
        self._reduction = reduction

    def __call__(self, logits, labels):
        return scattered_cross_entropy_loss(logits, labels, self._reduction)


def _reference_cross_entropy(logits, labels, reduction="mean"):
    log_sm = jax.nn.log_softmax(logits.astype(jnp.float32), axis=1)
    losses = -jnp.sum(log_sm * labels.astype(jnp.float32), axis=1)
    if reduction == "none":
        return losses
    elif reduction == "mean":
        return jnp.sum(losses) / logits.shape[0]
    elif reduction == "sum":
        return jnp.sum(losses)


if __name__ == "__main__":
    key = jax.random.PRNGKey(0)
    k1, k2, k3, k4, k5, k6 = jax.random.split(key, 6)

    # Small deterministic case: N=64 rows, C=128 classes (lane-aligned).
    N, C = 64, 128
    logits = jax.random.normal(k1, (N, C), dtype=jnp.float32)
    labels = jax.nn.softmax(
        jax.random.normal(k2, (N, C), dtype=jnp.float32), axis=1)

    loss_mean = ScatteredCrossEntropyLoss("mean")(logits, labels)
    loss_sum = scattered_cross_entropy_loss(logits, labels, reduction="sum")
    loss_none = scattered_cross_entropy_loss(logits, labels, reduction="none")

    # Ragged batch (N not a multiple of 8) exercises the padded-row mask.
    Nr, Cr = 50, 256
    logits_r = jax.random.normal(k3, (Nr, Cr), dtype=jnp.float32)
    labels_r = jax.nn.softmax(
        jax.random.normal(k4, (Nr, Cr), dtype=jnp.float32), axis=1)
    loss_r_mean = scattered_cross_entropy_loss(logits_r, labels_r, "mean")
    loss_r_none = scattered_cross_entropy_loss(logits_r, labels_r, "none")

    # bf16 inputs stay bf16 in HBM; the kernel upcasts internally.
    loss_bf16 = scattered_cross_entropy_loss(
        logits.astype(jnp.bfloat16), labels.astype(jnp.bfloat16), "mean")

    # Multi-tile + multi-chunk + ragged path via explicit small overrides.
    Nm, Cm = 300, 128
    logits_m = jax.random.normal(k5, (Nm, Cm), dtype=jnp.float32)
    labels_m = jax.nn.softmax(
        jax.random.normal(k6, (Nm, Cm), dtype=jnp.float32), axis=1)
    loss_m_none = scattered_cross_entropy_loss(
        logits_m, labels_m, "none", block_rows=256, chunk_rows=128)
    loss_m_mean = scattered_cross_entropy_loss(
        logits_m, labels_m, "mean", block_rows=256, chunk_rows=128)

    jax.block_until_ready((loss_mean, loss_sum, loss_none, loss_r_mean,
                           loss_r_none, loss_bf16, loss_m_none, loss_m_mean))

    ref_mean = _reference_cross_entropy(logits, labels, "mean")
    ref_sum = _reference_cross_entropy(logits, labels, "sum")
    ref_none = _reference_cross_entropy(logits, labels, "none")
    ref_r_mean = _reference_cross_entropy(logits_r, labels_r, "mean")
    ref_r_none = _reference_cross_entropy(logits_r, labels_r, "none")
    ref_bf16 = _reference_cross_entropy(
        logits.astype(jnp.bfloat16), labels.astype(jnp.bfloat16), "mean")
    ref_m_none = _reference_cross_entropy(logits_m, labels_m, "none")
    ref_m_mean = _reference_cross_entropy(logits_m, labels_m, "mean")

    assert jnp.allclose(loss_mean, ref_mean, rtol=1e-5, atol=1e-5), (loss_mean, ref_mean)
    assert jnp.allclose(loss_sum, ref_sum, rtol=1e-5, atol=1e-3), (loss_sum, ref_sum)
    assert jnp.allclose(loss_none, ref_none, rtol=1e-5, atol=1e-4)
    assert loss_none.shape == (N,)
    assert jnp.allclose(loss_r_mean, ref_r_mean, rtol=1e-5, atol=1e-5), (loss_r_mean, ref_r_mean)
    assert jnp.allclose(loss_r_none, ref_r_none, rtol=1e-5, atol=1e-4)
    assert loss_r_none.shape == (Nr,)
    assert jnp.allclose(loss_bf16, ref_bf16, rtol=1e-3, atol=1e-3), (loss_bf16, ref_bf16)
    assert jnp.allclose(loss_m_none, ref_m_none, rtol=1e-5, atol=1e-4)
    assert loss_m_none.shape == (Nm,)
    assert jnp.allclose(loss_m_mean, ref_m_mean, rtol=1e-5, atol=1e-4), (loss_m_mean, ref_m_mean)

    print("KERNEL_OK")
</pallas_src>

<mosaic_0001>
module attributes {stable_mosaic.version = 11 : i64} {
  func.func @_tile_sum_kernel(%arg0: i32, %arg1: memref<64x128xf32, #tpu.memory_space<vmem>>, %arg2: memref<64x128xf32, #tpu.memory_space<vmem>>, %arg3: memref<1x128xf32, #tpu.memory_space<vmem>>) attributes {dimension_semantics = [#tpu.dimension_semantics<parallel>], iteration_bounds = array<i64: 1>, scalar_prefetch = 0 : i64, scratch_operands = 0 : i64, tpu.core_type = #tpu.core_type<tc>, window_params = [{transform_indices = @transform_0, window_bounds = array<i64: 64, 128>}, {transform_indices = @transform_1, window_bounds = array<i64: 64, 128>}, {transform_indices = @transform_2, window_bounds = array<i64: 1, 128>}]} {
    %c0 = arith.constant 0 : index
    %c0_0 = arith.constant 0 : index
    %0 = vector.load %arg1[%c0, %c0_0] : memref<64x128xf32, #tpu.memory_space<vmem>>, vector<64x128xf32>
    %c0_1 = arith.constant 0 : index
    %c0_2 = arith.constant 0 : index
    %1 = vector.load %arg2[%c0_1, %c0_2] : memref<64x128xf32, #tpu.memory_space<vmem>>, vector<64x128xf32>
    %cst = arith.constant dense<0xFF800000> : vector<64xf32>
    %2 = vector.multi_reduction <maximumf>, %0, %cst [1] : vector<64x128xf32> to vector<64xf32>
    %3 = vector.shape_cast %2 : vector<64xf32> to vector<64x1xf32>
    %4 = vector.broadcast %3 : vector<64x1xf32> to vector<64x128xf32>
    %5 = arith.subf %0, %4 : vector<64x128xf32>
    %6 = math.exp %5 : vector<64x128xf32>
    %cst_3 = arith.constant dense<0.000000e+00> : vector<64xf32>
    %7 = vector.multi_reduction <add>, %6, %cst_3 [1] : vector<64x128xf32> to vector<64xf32>
    %8 = vector.shape_cast %7 : vector<64xf32> to vector<64x1xf32>
    %9 = math.log %8 : vector<64x1xf32>
    %10 = arith.addf %9, %3 : vector<64x1xf32>
    %11 = vector.broadcast %10 : vector<64x1xf32> to vector<64x128xf32>
    %12 = arith.subf %11, %0 : vector<64x128xf32>
    %13 = arith.mulf %1, %12 : vector<64x128xf32>
    %cst_4 = arith.constant dense<0.000000e+00> : vector<64xf32>
    %14 = vector.multi_reduction <add>, %13, %cst_4 [1] : vector<64x128xf32> to vector<64xf32>
    %15 = vector.shape_cast %14 : vector<64xf32> to vector<64x1xf32>
    %16 = vector.shape_cast %15 : vector<64x1xf32> to vector<1x64x1xf32>
    %cst_5 = arith.constant dense<0.000000e+00> : vector<1xf32>
    %17 = vector.multi_reduction <add>, %16, %cst_5 [1, 2] : vector<1x64x1xf32> to vector<1xf32>
    %18 = vector.shape_cast %17 : vector<1xf32> to vector<1x1x1xf32>
    %19 = vector.extract %18[0, 0, 0] : f32 from vector<1x1x1xf32>
    %20 = vector.broadcast %19 : f32 to vector<1x1xf32>
    %21 = tpu.iota {dimensions = array<i32: 1>} : vector<1x128xi32>
    %c0_i32 = arith.constant 0 : i32
    %22 = vector.broadcast %c0_i32 : i32 to vector<1x128xi32>
    %23 = arith.cmpi eq, %21, %22 : vector<1x128xi32>
    %cst_6 = arith.constant 0.000000e+00 : f32
    %24 = vector.shape_cast %20 : vector<1x1xf32> to vector<1x1xf32>
    %25 = vector.broadcast %24 : vector<1x1xf32> to vector<1x128xf32>
    %26 = vector.broadcast %cst_6 : f32 to vector<1x128xf32>
    %27 = arith.select %23, %25, %26 : vector<1x128xi1>, vector<1x128xf32>
    %c0_7 = arith.constant 0 : index
    %c0_8 = arith.constant 0 : index
    %28 = vector.load %arg3[%c0_7, %c0_8] : memref<1x128xf32, #tpu.memory_space<vmem>>, vector<1x128xf32>
    tpu.vector_store %arg3[%c0_7, %c0_8], %27 {strides = array<i32>} : memref<1x128xf32, #tpu.memory_space<vmem>>, vector<1x128xf32>,
    return
  }
  func.func @transform_0(%arg0: i32) -> (i32, i32) {
    %c0_i32 = arith.constant 0 : i32
    %c0_i32_0 = arith.constant 0 : i32
    return %arg0, %c0_i32 : i32, i32
  }
  func.func @transform_1(%arg0: i32) -> (i32, i32) {
    %c0_i32 = arith.constant 0 : i32
    %c0_i32_0 = arith.constant 0 : i32
    return %arg0, %c0_i32 : i32, i32
  }
  func.func @transform_2(%arg0: i32) -> (i32, i32) {
    %c0_i32 = arith.constant 0 : i32
    %c0_i32_0 = arith.constant 0 : i32
    return %arg0, %c0_i32 : i32, i32
  }
}

</mosaic_0001>

<bundles_post_ra>
// kernel: tpu_custom_call.1
= control target key start
LH: loop header
LB: loop body
LE: loop exit
PB: predicated region body
PF: predicated region fallthrough
CT: control target
= control target key end

     0   :  { %7 = vsyncpa [#allocation3], 0  ;;  %s439_s0 = inlined_call_operand.hbm [shape: f32[64,128], index: 0, kind: input, shape index: {}]   ;;  %s440_s1 = inlined_call_operand.hbm [shape: f32[64,128], index: 1, kind: input, shape index: {}]   ;;  %s441_s2 = inlined_call_operand.hbm [shape: f32[1,128], index: 2, kind: output, shape index: {}]  }
   0x1   :  { %8 = vsyncpa [#allocation6], 0 }
   0x2   :  { %9 = vsyncpa [#allocation4], 0  ;;  %s14_s11 = sshll.u32 %s439_s0, 4  ;;  %s338_s12 = smov [#allocation2]   ;;  %s15_s11 = int_to_ptr.hbm [resolvable:$true] %s14_s11 }
   0x3   :  { %s16_s13 = sshll.u32 %s338_s12, 4  ;;  %s27_s16 = sshll.u32 %s440_s1, 4  ;;  %s17_s13 = int_to_ptr.vmem [resolvable:$true] %s16_s13  ;;  %s28_s16 = int_to_ptr.hbm [resolvable:$true] %s27_s16 }
   0x4   :  { %s339_s17 = smov 128   ;;  %s340_s18 = smov 8  }
   0x5   :  { %22 = dma.hbm_to_vmem [thread:$0]  %s15_s11, 1024, %s17_s13, [#allocation3], %s339_s17, %s339_s17, %s340_s18  }
   0x6   :  { %s341_s19 = smov [#allocation5]  }
   0x7   :  { %s29_s20 = sshll.u32 %s341_s19, 4  ;;  %s30_s20 = int_to_ptr.vmem [resolvable:$true] %s29_s20 }
   0x8   :  { %35 = dma.hbm_to_vmem [thread:$0]  %s28_s16, 1024, %s30_s20, [#allocation6], %s339_s17, %s339_s17, %s340_s18  }
   0x9   :  { %332 = dma.done.wait [#allocation3], 1024  }
   0xa   :  { %333 = vsyncadd [#allocation3], 4294966272 }
   0xb   :  { %334 = dma.done.wait [#allocation6], 1024  }
   0xc   :  { %335 = vsyncadd [#allocation6], 4294966272  ;;  %v364_v0 = vld [vmem:[#allocation2 + $0x20] sm:$0xff]  ;;  %v366_v1 = vld [vmem:[#allocation2 + $0x10] sm:$0xff]  ;;  %vm172_vm0 = vcmask 7168   ;;  %s342_s0 = smov [#allocation7]  }
   0xd   :  { %v368_v2 = vld [vmem:[#allocation2] sm:$0xff]  ;;  %68 = vmax.xlane.f32.xlu2 %v364_v0  ;;  %64 = vmax.xlane.f32.xlu1 %v366_v1  ;;  %v373_v3 = vld [vmem:[#allocation2 + $0x28] sm:$0xff]  ;;  %v375_v4 = vld [vmem:[#allocation2 + $0x18] sm:$0xff]  ;;  %s208_s1 = sshll.u32 %s342_s0, 4  ;;  %s210_s23 = sshll.u32 %s441_s2, 4  ;;  %s209_s1 = int_to_ptr.vmem [resolvable:$true] %s208_s1  ;;  %s211_s23 = int_to_ptr.hbm [resolvable:$true] %s210_s23 }
   0xe   :  { %60 = vmax.xlane.f32.xlu0 %v368_v2  ;;  %v377_v5 = vld [vmem:[#allocation2 + $0x8] sm:$0xff]  ;;  %v382_v6 = vld [vmem:[#allocation2 + $0x38] sm:$0xff]  ;;  %v384_v7 = vld [vmem:[#allocation2 + $0x30] sm:$0xff] }
   0xf   :  { %v54_v51 = vld [vmem:[#allocation5 + $0x10] sm:$0xff]  ;;  %v52_v52 = vld [vmem:[#allocation5] sm:$0xff] }
  0x15   :  { %70 = vmax.xlane.f32.xlu2 %v373_v3  ;;  %66 = vmax.xlane.f32.xlu1 %v375_v4 }
  0x16   :  { %62 = vmax.xlane.f32.xlu0 %v377_v5 }
  0x1d   :  { %74 = vmax.xlane.f32.xlu1 %v382_v6 }
  0x1e   :  { %72 = vmax.xlane.f32.xlu0 %v384_v7 }
  0x80   :  { %v388_v8 = vpop.xlane.xlu2 %68  ;;  %v65_v9 = vpop.xlane.xlu1 %64 }
  0x81   :  { %v78_v10 = vsub.f32 %v366_v1, %v65_v9  ;;  %v61_v11 = vpop.xlane.xlu0 %60  ;;  %v80_v26 = vsub.f32 %v364_v0, %v388_v8 }
  0x82   :  { %v76_v12 = vsub.f32 %v368_v2, %v61_v11 }
  0x83   :  { %v88_v13 = vmul.f32 1.442695, %v78_v10  ;;  %v92_v31 = vmul.f32 1.442695, %v80_v26 }
  0x84   :  { %v84_v14 = vmul.f32 1.442695, %v76_v12  ;;  %v55_v12 = vld [vmem:[#allocation5 + $0x18] sm:$0xff] }
  0x85   :  { %228 = vpow2.f32 %v88_v13 }
  0x86   :  { %230 = vpow2.f32 %v84_v14 }
  0x88   :  { %v392_v15 = vpop.xlane.xlu2 %70  ;;  %v394_v16 = vpop.xlane.xlu1 %66 }
  0x89   :  { %v81_v17 = vsub.f32 %v373_v3, %v392_v15  ;;  %v79_v18 = vsub.f32 %v375_v4, %v394_v16  ;;  %v400_v19 = vpop.xlane.xlu0 %62 }
  0x8a   :  { %v77_v20 = vsub.f32 %v377_v5, %v400_v19 }
  0x8b   :  { %v94_v21 = vmul.f32 1.442695, %v81_v17  ;;  %v90_v22 = vmul.f32 1.442695, %v79_v18  ;;  %v229_v23 = vpop.eup %228  ;;  %v53_v17 = vld [vmem:[#allocation5 + $0x8] sm:$0xff] }
  0x8c   :  { %v86_v24 = vmul.f32 1.442695, %v77_v20  ;;  %v231_v25 = vpop.eup %230  ;;  %104 = vadd.xlane.f32.xlu1 %v229_v23 }
  0x8d   :  { %232 = vpow2.f32 %v94_v21  ;;  %100 = vadd.xlane.f32.xlu2 %v231_v25 }
  0x8e   :  { %234 = vpow2.f32 %v90_v22 }
  0x8f   :  { %236 = vpow2.f32 %v86_v24 }
  0x90   :  { %v410_v29 = vpop.xlane.xlu1 %74 }
  0x91   :  { %v406_v27 = vpop.xlane.xlu0 %72  ;;  %v83_v35 = vsub.f32 %v382_v6, %v410_v29 }
  0x92   :  { %v82_v28 = vsub.f32 %v384_v7, %v406_v27 }
  0x93   :  { %v233_v30 = vpop.eup %232  ;;  %v98_v36 = vmul.f32 1.442695, %v83_v35  ;;  %v59_v35 = vld [vmem:[#allocation5 + $0x38] sm:$0xff] }
  0x94   :  { %v235_v32 = vpop.eup %234  ;;  %v96_v33 = vmul.f32 1.442695, %v82_v28  ;;  %110 = vadd.xlane.f32.xlu1 %v233_v30  ;;  %v56_v28 = vld [vmem:[#allocation5 + $0x20] sm:$0xff] }
  0x95   :  { %v237_v34 = vpop.eup %236  ;;  %106 = vadd.xlane.f32.xlu2 %v235_v32 }
  0x96   :  { %238 = vpow2.f32 %v96_v33  ;;  %102 = vadd.xlane.f32.xlu0 %v237_v34 }
  0x97   :  { %240 = vpow2.f32 %v92_v31 }
  0x98   :  { %242 = vpow2.f32 %v98_v36 }
  0x9c   :  { %v239_v37 = vpop.eup %238 }
  0x9d   :  { %v241_v38 = vpop.eup %240  ;;  %112 = vadd.xlane.f32.xlu2 %v239_v37 }
  0x9e   :  { %108 = vadd.xlane.f32.xlu0 %v241_v38  ;;  %v243_v39 = vpop.eup %242 }
  0xa6   :  { %114 = vadd.xlane.f32.xlu0 %v243_v39 }
  0xff   :  { %v105_v40 = vpop.xlane.xlu1 %104 }
 0x100   :  { %244 = vlog2.f32 %v105_v40  ;;  %v101_v41 = vpop.xlane.xlu2 %100 }
 0x101   :  { %246 = vlog2.f32 %v101_v41 }
 0x106   :  { %v245_v42 = vpop.eup %244 }
 0x107   :  { %v247_v43 = vpop.eup %246  ;;  %v121_v44 = vmul.f32 0.6931472, %v245_v42  ;;  %v111_v45 = vpop.xlane.xlu1 %110 }
 0x108   :  { %v117_v46 = vmul.f32 0.6931472, %v247_v43  ;;  %248 = vlog2.f32 %v111_v45  ;;  %v107_v47 = vpop.xlane.xlu2 %106 }
 0x109   :  { %v103_v48 = vpop.xlane.xlu0 %102  ;;  %v134_v49 = vadd.f32 %v121_v44, %v65_v9  ;;  %250 = vlog2.f32 %v107_v47 }
 0x10a   :  { %v132_v50 = vadd.f32 %v117_v46, %v61_v11  ;;  %252 = vlog2.f32 %v103_v48 }
 0x10b   :  { %v142_v53 = vsub.f32 %v134_v49, %v366_v1  ;;  %v57_v1 = vld [vmem:[#allocation5 + $0x28] sm:$0xff] }
 0x10c   :  { %v140_v54 = vsub.f32 %v132_v50, %v368_v2 }
 0x10d   :  { %v150_v55 = vmul.f32 %v142_v53, %v54_v51 }
 0x10e   :  { %v249_v56 = vpop.eup %248  ;;  %v148_v57 = vmul.f32 %v140_v54, %v52_v52 }
 0x10f   :  { %v251_v58 = vpop.eup %250  ;;  %v127_v59 = vmul.f32 0.6931472, %v249_v56  ;;  %160 = vadd.xlane.f32.xlu0 %v150_v55 }
 0x110   :  { %v253_v60 = vpop.eup %252  ;;  %v123_v61 = vmul.f32 0.6931472, %v251_v58  ;;  %156 = vadd.xlane.f32.xlu1 %v148_v57  ;;  %v113_v62 = vpop.xlane.xlu2 %112 }
 0x111   :  { %v109_v63 = vpop.xlane.xlu0 %108  ;;  %v137_v9 = vadd.f32 %v127_v59, %v392_v15  ;;  %v119_v10 = vmul.f32 0.6931472, %v253_v60  ;;  %254 = vlog2.f32 %v113_v62  ;;  %v197_v62 = vlaneseq }
 0x112   :  { %v135_v11 = vadd.f32 %v123_v61, %v394_v16  ;;  %256 = vlog2.f32 %v109_v63 }
 0x113   :  { %v133_v2 = vadd.f32 %v119_v10, %v400_v19  ;;  %v145_v13 = vsub.f32 %v137_v9, %v373_v3  ;;  %v198_v63 = vand.u32 127, %v197_v62 }
 0x114   :  { %v143_v14 = vsub.f32 %v135_v11, %v375_v4  ;;  %v58_v4 = vld [vmem:[#allocation5 + $0x30] sm:$0xff] }
 0x115   :  { %v153_v18 = vmul.f32 %v145_v13, %v57_v1  ;;  %v141_v20 = vsub.f32 %v133_v2, %v377_v5  ;;  %vm199_vm1 = vcmp.eq.s32.totalorder %v198_v63, 0 }
 0x116   :  { %v151_v21 = vmul.f32 %v143_v14, %v55_v12 }
 0x117   :  { %v255_v22 = vpop.eup %254  ;;  %166 = vadd.xlane.f32.xlu0 %v153_v18  ;;  %v149_v15 = vmul.f32 %v141_v20, %v53_v17 }
 0x118   :  { %v257_v23 = vpop.eup %256  ;;  %v129_v24 = vmul.f32 0.6931472, %v255_v22  ;;  %162 = vadd.xlane.f32.xlu1 %v151_v21 }
 0x119   :  { %v115_v16 = vpop.xlane.xlu0 %114  ;;  %v125_v25 = vmul.f32 0.6931472, %v257_v23  ;;  %158 = vadd.xlane.f32.xlu2 %v149_v15 }
 0x11a   :  { %258 = vlog2.f32 %v115_v16  ;;  %v138_v19 = vadd.f32 %v129_v24, %v406_v27 }
 0x11b   :  { %v136_v3 = vadd.f32 %v125_v25, %v388_v8 }
 0x11c   :  { %v146_v26 = vsub.f32 %v138_v19, %v384_v7 }
 0x11d   :  { %v144_v5 = vsub.f32 %v136_v3, %v364_v0 }
 0x11e   :  { %v154_v30 = vmul.f32 %v146_v26, %v58_v4 }
 0x11f   :  { %v152_v32 = vmul.f32 %v144_v5, %v56_v28 }
 0x120   :  { %v259_v31 = vpop.eup %258  ;;  %168 = vadd.xlane.f32.xlu1 %v154_v30 }
 0x121   :  { %v131_v33 = vmul.f32 0.6931472, %v259_v31  ;;  %164 = vadd.xlane.f32.xlu2 %v152_v32 }
 0x123   :  { %v139_v34 = vadd.f32 %v131_v33, %v410_v29 }
 0x125   :  { %v147_v36 = vsub.f32 %v139_v34, %v382_v6 }
 0x127   :  { %v155_v27 = vmul.f32 %v147_v36, %v59_v35 }
 0x129   :  { %170 = vadd.xlane.f32.xlu2 %v155_v27 }
 0x182   :  { %v161_v37 = vpop.xlane.xlu0 %160 }
 0x183   :  { %v157_v8 = vpop.xlane.xlu1 %156  ;;  %v176_v41 = vsel %vm172_vm0, %v161_v37, 0.0 }
 0x184   :  { %v173_v38 = vsel %vm172_vm0, %v157_v8, 0.0 }
 0x18a   :  { %v167_v43 = vpop.xlane.xlu0 %166 }
 0x18b   :  { %v163_v39 = vpop.xlane.xlu1 %162  ;;  %v182_v47 = vsel %vm172_vm0, %v167_v43, 0.0 }
 0x18c   :  { %v159_v7 = vpop.xlane.xlu2 %158  ;;  %v178_v29 = vsel %vm172_vm0, %v163_v39, 0.0 }
 0x18d   :  { %v174_v0 = vsel %vm172_vm0, %v159_v7, 0.0 }
 0x18e   :  { %v175_v40 = vadd.f32 %v174_v0, %v173_v38 }
 0x190   :  { %v177_v42 = vadd.f32 %v176_v41, %v175_v40 }
 0x192   :  { %v179_v6 = vadd.f32 %v178_v29, %v177_v42 }
 0x193   :  { %v169_v48 = vpop.xlane.xlu1 %168 }
 0x194   :  { %v165_v44 = vpop.xlane.xlu2 %164  ;;  %v184_v50 = vsel %vm172_vm0, %v169_v48, 0.0 }
 0x195   :  { %v180_v45 = vsel %vm172_vm0, %v165_v44, 0.0 }
 0x196   :  { %v181_v46 = vadd.f32 %v180_v45, %v179_v6 }
 0x198   :  { %v183_v49 = vadd.f32 %v182_v47, %v181_v46 }
 0x19a   :  { %v185_v52 = vadd.f32 %v184_v50, %v183_v49 }
 0x19c   :  { %v171_v51 = vpop.xlane.xlu2 %170 }
 0x19d   :  { %v186_v53 = vsel %vm172_vm0, %v171_v51, 0.0 }
 0x19e   :  { %v187_v54 = vadd.f32 %v186_v53, %v185_v52 }
 0x1a0   :  { %188 = vadd.xlane.f32.xlu0 %v187_v54 }
 0x213   :  { %v189_v55 = vpop.xlane.xlu0 %188 }
 0x214   :  { %v190_v56 = vrot.slane %v189_v55, 4 }
 0x216   :  { %v191_v57 = vadd.f32 %v190_v56, %v189_v55 }
 0x218   :  { %v192_v58 = vrot.slane %v191_v57, 2 }
 0x21a   :  { %v193_v59 = vadd.f32 %v192_v58, %v191_v57 }
 0x21c   :  { %v194_v60 = vrot.slane %v193_v59, 1 }
 0x21e   :  { %v195_v61 = vadd.f32 %v194_v60, %v193_v59 }
 0x220   :  { %221 = vpush %v195_v61 }
 0x251   :  { %s222_s24 = spop %221 }
 0x252   :  { %v200_v9 = vstv %s222_s24 }
 0x253   :  { %v201_v10 = vsel %vm199_vm1, %v200_v9, 0.0 }
 0x254   :  { %202 = vst [vmem:[#allocation7] sm:$0x1] %v201_v10 }
 0x255   :  { %213 = dma.vmem_to_hbm [thread:$0]  %s209_s1, 16, %s211_s23, [#allocation4]  }
 0x256   :  { %336 = dma.done.wait [#allocation4], 16  }
 0x257   :  { %337 = vsyncadd [#allocation4], 4294967280 }
 0x258   :  { %218 = vsyncpa [#allocation3], 1 }
 0x259   :  { %219 = vsyncpa [#allocation6], 1 }
 0x25a   :  { %220 = vsyncpa [#allocation4], 1 }

</bundles_post_ra>
